<compile_context>
chip_gen: v5e
topology: v5e:2x2
jax: 0.10.0
libtpu: 0.0.40
codegen_flags: <defaults>
</compile_context>

<pallas_src>
import jax
import jax.numpy as jnp
from jax import lax
from jax.experimental import pallas as pl
from jax.experimental.pallas import tpu as pltpu

EPS = 1e-5


def _round_up(x, m):
    return ((x + m - 1) // m) * m


def _choose_samples_per_block(n, ppad, cin, cout,
                              lane_target=512, vmem_budget=24 << 20, max_fold=8):
    """How many samples to fold onto the lane axis of one grid block."""
    # taps(bf16) + out(bf16) + rough f32 temporaries per sample
    per_sample = ppad * (4 * cin * 2 + 4 * cout * 2 + 4 * cout * 4 * 2)
    nb = 1
    for cand in range(1, n + 1):
        if cand > max_fold:
            break
        if n % cand:
            continue
        if cand * per_sample > vmem_budget:
            break
        nb = cand
        if cand * ppad >= lane_target:
            break
    return nb


def _make_kernel(nb, ppad, inv_count):
    """ConvTranspose (as one matmul) + InstanceNorm + ReLU for NB folded samples."""

    def kernel(p_ref, w_ref, o_ref):
        # p_ref: (1, 4*Cin, NB*Ppad)   bf16   sub-pixel tap matrix (samples along lanes)
        # w_ref: (4*Cout, 4*Cin)       bf16   phase-major flattened transpose-conv weights
        # o_ref: (1, 4, Cout, NB*Ppad) bf16   phase-major output (lane dim = NB*Ppad)
        nph, cout = o_ref.shape[1], o_ref.shape[2]

        # Hot path: one lane-dense MXU matmul, f32 accumulation.
        acc4 = jnp.dot(w_ref[...], p_ref[0],
                       preferred_element_type=jnp.float32
                       ).reshape(nph, cout, nb * ppad)          # (4, Cout, NB*Ppad)

        # Per-sample InstanceNorm (stats pooled over 4 phases x P real positions;
        # zero-padded lanes contribute 0 to both sum and sumsq, so stats stay exact).
        for s in range(nb):                                     # static unroll (NB small)
            lo = s * ppad
            a = acc4[:, :, lo:lo + ppad]                        # (4, Cout, Ppad) f32
            s1 = jnp.sum(jnp.sum(a, axis=2, keepdims=True),
                         axis=0, keepdims=True)                 # (1, Cout, 1)
            s2 = jnp.sum(jnp.sum(a * a, axis=2, keepdims=True),
                         axis=0, keepdims=True)                 # (1, Cout, 1)
            mean = s1 * inv_count
            var = jnp.maximum(s2 * inv_count - mean * mean, 0.0)
            rstd = lax.rsqrt(var + EPS)                         # EUP slot
            y = jnp.maximum((a - mean) * rstd, 0.0)             # IN + ReLU, fused store
            o_ref[0, :, :, pl.ds(lo, ppad)] = y.astype(o_ref.dtype)

    return kernel


def conv_trans_block(x_nchw, w_t, *, stride=2, padding=1, output_padding=1,
                     out_dtype=None):
    """Forward pass of ConvTransBlock.

    x_nchw: (N, Cin, H, W)        float32 (or bf16)
    w_t   : (Cin, Cout, KH, KW)   ConvTranspose2d weight (PyTorch layout)
    returns (N, Cout, 2H, 2W) in bf16 (set out_dtype to up-cast if the consumer needs it).
    """
    N, Cin, H, W = x_nchw.shape
    Cin_w, Cout, KH, KW = w_t.shape
    assert Cin == Cin_w
    assert (stride, padding, output_padding, KH, KW) == (2, 1, 1, 3, 3), (
        "4-phase decomposition is specialized to the module defaults "
        "(k=3, stride=2, padding=1, output_padding=1)")
    Ho, Wo = 2 * H, 2 * W
    P = H * W
    Ppad = _round_up(P, 128)                      # lane-dense loads / unmasked stores
    NB = _choose_samples_per_block(N, Ppad, Cin, Cout)
    NBLK = N // NB
    L = NB * Ppad                                 # lane extent of one block

    # --- glue: sub-pixel tap matrix, bf16-first (channels-first, lane dim = spatial) ----
    # tap t = 2*dy+dx, (dy,dx) in {(0,0),(0,1),(1,0),(1,1)}; zero-pad high edge for +1 taps
    xb = x_nchw.astype(jnp.bfloat16)
    xp = jnp.pad(xb, ((0, 0), (0, 0), (0, 1), (0, 1)))
    taps = [xp[:, :, dy:dy + H, dx:dx + W] for dy in (0, 1) for dx in (0, 1)]
    t = jnp.concatenate(taps, axis=1).reshape(N, 4 * Cin, P)    # (N, 4*Cin, P) bf16
    if Ppad != P:
        t = jnp.pad(t, ((0, 0), (0, 0), (0, Ppad - P)))
    # fold NB samples onto the lane axis: lane = s*Ppad + spatial
    patchesT = (t.reshape(NBLK, NB, 4 * Cin, Ppad)
                 .transpose(0, 2, 1, 3)
                 .reshape(NBLK, 4 * Cin, L))                    # (NBLK, 4*Cin, NB*Ppad)

    # --- glue: phase-major weight matrix -------------------------------------------------
    # WT[p*Cout + co, t*Cin + ci] = w_t[ci, co, kh, kw] with kh = r+1-2*dy, kw = s+1-2*dx
    # (p = 2r+s, t = 2*dy+dx); zero where kh/kw fall outside the 3x3 kernel.
    zero = jnp.zeros((Cout, Cin), w_t.dtype)
    phase_rows = []
    for r in (0, 1):
        for s_ in (0, 1):
            row = []
            for dy in (0, 1):
                for dx in (0, 1):
                    kh = r + 1 - 2 * dy
                    kw = s_ + 1 - 2 * dx
                    if 0 <= kh < KH and 0 <= kw < KW:
                        row.append(w_t[:, :, kh, kw].T)          # (Cout, Cin)
                    else:
                        row.append(zero)
            phase_rows.append(jnp.concatenate(row, axis=1))      # (Cout, 4*Cin)
    WT = jnp.concatenate(phase_rows, axis=0).astype(jnp.bfloat16)  # (4*Cout, 4*Cin)

    # --- VMEM budget / compiler params ---------------------------------------------------
    in_block = 4 * Cin * L * 2
    out_block = 4 * Cout * L * 2
    w_bytes = (4 * Cout) * (4 * Cin) * 2
    f32_tmp = 2 * (4 * Cout * L * 4)             # acc + normalized temp (rough)
    est = 2 * (in_block + out_block) + 2 * w_bytes + f32_tmp + (2 << 20)
    if est > (56 << 20):
        # TODO(synk): switch to the P-tiled two-pass InstanceNorm path for this size.
        raise NotImplementedError(
            "per-sample block too large for single-pass InstanceNorm; needs P tiling")
    vmem_limit = int(min(max(est, 32 << 20), 60 << 20))

    inv_count = 1.0 / float(4 * P)               # true element count: (2H)*(2W)
    kernel = _make_kernel(NB, Ppad, inv_count)

    flops = 2 * N * (4 * Cout) * (4 * Cin) * Ppad
    bytes_accessed = patchesT.size * 2 + WT.size * 2 + NBLK * 4 * Cout * L * 2

    out = pl.pallas_call(
        kernel,
        out_shape=jax.ShapeDtypeStruct((NBLK, 4, Cout, L), jnp.bfloat16),
        grid_spec=pltpu.PrefetchScalarGridSpec(
            num_scalar_prefetch=0,
            grid=(NBLK,),
            in_specs=[
                pl.BlockSpec((1, 4 * Cin, L), lambda b: (b, 0, 0)),
                pl.BlockSpec((4 * Cout, 4 * Cin), lambda b: (0, 0)),
            ],
            out_specs=pl.BlockSpec((1, 4, Cout, L), lambda b: (b, 0, 0, 0)),
        ),
        compiler_params=pltpu.CompilerParams(
            dimension_semantics=("parallel",),
            vmem_limit_bytes=vmem_limit),
        cost_estimate=pl.CostEstimate(
            flops=flops,
            transcendentals=N * Cout,
            bytes_accessed=bytes_accessed),
    )(patchesT, WT)

    # --- glue: phase de-interleave back to NCHW (bf16, half the rev-1 traffic) ----------
    # out[blk, r, s, c, nb, j]  ==  y[blk*NB+nb, c, 2m+r, 2n'+s]  with j = m*W + n'
    out = out.reshape(NBLK, 2, 2, Cout, NB, Ppad)
    if Ppad != P:
        out = out[..., :P]
    out = out.reshape(NBLK, 2, 2, Cout, NB, H, W)
    out = jnp.transpose(out, (0, 4, 3, 5, 1, 6, 2)).reshape(N, Cout, Ho, Wo)
    if out_dtype is not None:
        out = out.astype(out_dtype)
    return out


def reference(x_nchw, w_t, *, stride=2, padding=1, output_padding=1):
    """Pure-JAX f32 reference matching PyTorch ConvTranspose2d + InstanceNorm2d + ReLU."""
    Cin, Cout, KH, KW = w_t.shape
    w = jnp.transpose(w_t, (1, 0, 2, 3))[:, :, ::-1, ::-1]       # OIHW, flipped
    lo = KH - 1 - padding
    hi = KH - 1 - padding + output_padding
    y = lax.conv_general_dilated(
        x_nchw, w, window_strides=(1, 1), padding=[(lo, hi), (lo, hi)],
        lhs_dilation=(stride, stride),
        dimension_numbers=("NCHW", "OIHW", "NCHW"))
    mean = jnp.mean(y, axis=(2, 3), keepdims=True)
    var = jnp.mean((y - mean) ** 2, axis=(2, 3), keepdims=True)
    y = (y - mean) / jnp.sqrt(var + EPS)
    return jnp.maximum(y, 0.0)


if __name__ == "__main__":
    # Small shapes consistent with the module: in_size=4, out_size=8, 16x16 spatial.
    N, Cin, Cout, H, W = 2, 4, 8, 16, 16
    key = jax.random.PRNGKey(0)
    kx, kw = jax.random.split(key)
    x = jax.random.normal(kx, (N, Cin, H, W), dtype=jnp.float32)
    # Deterministic synthetic ConvTranspose2d weight, PyTorch layout (Cin, Cout, KH, KW).
    w_t = 0.1 * jax.random.normal(kw, (Cin, Cout, 3, 3), dtype=jnp.float32)

    out = conv_trans_block(x, w_t)
    out = jax.block_until_ready(out)

    ref = reference(x, w_t)
    assert out.shape == (N, Cout, 32, 32), out.shape
    assert out.dtype == jnp.bfloat16, out.dtype
    # bf16 taps/weights/output on the MXU path -> bf16-level tolerance vs f32 reference.
    err = float(jnp.max(jnp.abs(out.astype(jnp.float32) - ref)))
    assert jnp.allclose(out.astype(jnp.float32), ref, atol=5e-2, rtol=5e-2), err

    print("KERNEL_OK")
</pallas_src>

<mosaic_0001>
module attributes {stable_mosaic.version = 11 : i64} {
  func.func @kernel(%arg0: i32, %arg1: memref<1x16x512xbf16, #tpu.memory_space<vmem>>, %arg2: memref<32x16xbf16, #tpu.memory_space<vmem>>, %arg3: memref<1x4x8x512xbf16, #tpu.memory_space<vmem>>) attributes {dimension_semantics = [#tpu.dimension_semantics<parallel>], iteration_bounds = array<i64: 1>, scalar_prefetch = 0 : i64, scratch_operands = 0 : i64, tpu.core_type = #tpu.core_type<tc>, window_params = [{transform_indices = @transform_0, window_bounds = array<i64: 1, 16, 512>}, {pipeline_mode = #tpu.pipeline_mode<synchronous>, transform_indices = @transform_1, window_bounds = array<i64: 32, 16>}, {transform_indices = @transform_2, window_bounds = array<i64: 1, 4, 8, 512>}]} {
    %c0 = arith.constant 0 : index
    %c0_0 = arith.constant 0 : index
    %0 = vector.load %arg2[%c0, %c0_0] : memref<32x16xbf16, #tpu.memory_space<vmem>>, vector<32x16xbf16>
    %c0_1 = arith.constant 0 : index
    %c0_2 = arith.constant 0 : index
    %c0_3 = arith.constant 0 : index
    %1 = vector.load %arg1[%c0_1, %c0_2, %c0_3] : memref<1x16x512xbf16, #tpu.memory_space<vmem>>, vector<1x16x512xbf16>
    %2 = vector.shape_cast %1 : vector<1x16x512xbf16> to vector<16x512xbf16>
    %cst = arith.constant dense<0.000000e+00> : vector<32x512xf32>
    %3 = tpu.matmul %0, %2, %cst {dimension_numbers = #tpu.dot_dimension_numbers<[1], [0], [0], [1], [0, 0, 1, 1], [], []>} : vector<32x16xbf16>, vector<16x512xbf16>, vector<32x512xf32> -> vector<32x512xf32>
    %4 = vector.shape_cast %3 : vector<32x512xf32> to vector<4x8x512xf32>
    %5 = vector.extract_strided_slice %4 {offsets = [0, 0, 0], sizes = [4, 8, 256], strides = [1, 1, 1]} : vector<4x8x512xf32> to vector<4x8x256xf32>
    %cst_4 = arith.constant dense<0.000000e+00> : vector<4x8xf32>
    %6 = vector.multi_reduction <add>, %5, %cst_4 [2] : vector<4x8x256xf32> to vector<4x8xf32>
    %7 = vector.shape_cast %6 : vector<4x8xf32> to vector<4x8x1xf32>
    %cst_5 = arith.constant dense<0.000000e+00> : vector<8x1xf32>
    %8 = vector.multi_reduction <add>, %7, %cst_5 [0] : vector<4x8x1xf32> to vector<8x1xf32>
    %9 = vector.shape_cast %8 : vector<8x1xf32> to vector<1x8x1xf32>
    %10 = arith.mulf %5, %5 : vector<4x8x256xf32>
    %cst_6 = arith.constant dense<0.000000e+00> : vector<4x8xf32>
    %11 = vector.multi_reduction <add>, %10, %cst_6 [2] : vector<4x8x256xf32> to vector<4x8xf32>
    %12 = vector.shape_cast %11 : vector<4x8xf32> to vector<4x8x1xf32>
    %cst_7 = arith.constant dense<0.000000e+00> : vector<8x1xf32>
    %13 = vector.multi_reduction <add>, %12, %cst_7 [0] : vector<4x8x1xf32> to vector<8x1xf32>
    %14 = vector.shape_cast %13 : vector<8x1xf32> to vector<1x8x1xf32>
    %cst_8 = arith.constant 9.765625E-4 : f32
    %15 = vector.broadcast %cst_8 : f32 to vector<1x8x1xf32>
    %16 = arith.mulf %9, %15 : vector<1x8x1xf32>
    %cst_9 = arith.constant 9.765625E-4 : f32
    %17 = vector.broadcast %cst_9 : f32 to vector<1x8x1xf32>
    %18 = arith.mulf %14, %17 : vector<1x8x1xf32>
    %19 = arith.mulf %16, %16 : vector<1x8x1xf32>
    %20 = arith.subf %18, %19 : vector<1x8x1xf32>
    %cst_10 = arith.constant 0.000000e+00 : f32
    %21 = vector.broadcast %cst_10 : f32 to vector<1x8x1xf32>
    %22 = arith.maximumf %20, %21 : vector<1x8x1xf32>
    %cst_11 = arith.constant 9.99999974E-6 : f32
    %23 = vector.broadcast %cst_11 : f32 to vector<1x8x1xf32>
    %24 = arith.addf %22, %23 : vector<1x8x1xf32>
    %25 = math.rsqrt %24 : vector<1x8x1xf32>
    %26 = vector.broadcast %16 : vector<1x8x1xf32> to vector<4x8x256xf32>
    %27 = arith.subf %5, %26 : vector<4x8x256xf32>
    %28 = vector.broadcast %25 : vector<1x8x1xf32> to vector<4x8x256xf32>
    %29 = arith.mulf %27, %28 : vector<4x8x256xf32>
    %cst_12 = arith.constant 0.000000e+00 : f32
    %30 = vector.broadcast %cst_12 : f32 to vector<4x8x256xf32>
    %31 = arith.maximumf %29, %30 : vector<4x8x256xf32>
    %32 = arith.truncf %31 : vector<4x8x256xf32> to vector<4x8x256xbf16>
    %c0_13 = arith.constant 0 : index
    %c0_14 = arith.constant 0 : index
    %c0_15 = arith.constant 0 : index
    %c0_16 = arith.constant 0 : index
    %33 = vector.load %arg3[%c0_13, %c0_14, %c0_15, %c0_16] : memref<1x4x8x512xbf16, #tpu.memory_space<vmem>>, vector<1x4x8x256xbf16>
    %34 = vector.shape_cast %33 : vector<1x4x8x256xbf16> to vector<4x8x256xbf16>
    %35 = vector.shape_cast %32 : vector<4x8x256xbf16> to vector<1x4x8x256xbf16>
    tpu.vector_store %arg3[%c0_13, %c0_14, %c0_15, %c0_16], %35 {strides = array<i32>} : memref<1x4x8x512xbf16, #tpu.memory_space<vmem>>, vector<1x4x8x256xbf16>,
    %36 = vector.extract_strided_slice %4 {offsets = [0, 0, 256], sizes = [4, 8, 256], strides = [1, 1, 1]} : vector<4x8x512xf32> to vector<4x8x256xf32>
    %cst_17 = arith.constant dense<0.000000e+00> : vector<4x8xf32>
    %37 = vector.multi_reduction <add>, %36, %cst_17 [2] : vector<4x8x256xf32> to vector<4x8xf32>
    %38 = vector.shape_cast %37 : vector<4x8xf32> to vector<4x8x1xf32>
    %cst_18 = arith.constant dense<0.000000e+00> : vector<8x1xf32>
    %39 = vector.multi_reduction <add>, %38, %cst_18 [0] : vector<4x8x1xf32> to vector<8x1xf32>
    %40 = vector.shape_cast %39 : vector<8x1xf32> to vector<1x8x1xf32>
    %41 = arith.mulf %36, %36 : vector<4x8x256xf32>
    %cst_19 = arith.constant dense<0.000000e+00> : vector<4x8xf32>
    %42 = vector.multi_reduction <add>, %41, %cst_19 [2] : vector<4x8x256xf32> to vector<4x8xf32>
    %43 = vector.shape_cast %42 : vector<4x8xf32> to vector<4x8x1xf32>
    %cst_20 = arith.constant dense<0.000000e+00> : vector<8x1xf32>
    %44 = vector.multi_reduction <add>, %43, %cst_20 [0] : vector<4x8x1xf32> to vector<8x1xf32>
    %45 = vector.shape_cast %44 : vector<8x1xf32> to vector<1x8x1xf32>
    %cst_21 = arith.constant 9.765625E-4 : f32
    %46 = vector.broadcast %cst_21 : f32 to vector<1x8x1xf32>
    %47 = arith.mulf %40, %46 : vector<1x8x1xf32>
    %cst_22 = arith.constant 9.765625E-4 : f32
    %48 = vector.broadcast %cst_22 : f32 to vector<1x8x1xf32>
    %49 = arith.mulf %45, %48 : vector<1x8x1xf32>
    %50 = arith.mulf %47, %47 : vector<1x8x1xf32>
    %51 = arith.subf %49, %50 : vector<1x8x1xf32>
    %cst_23 = arith.constant 0.000000e+00 : f32
    %52 = vector.broadcast %cst_23 : f32 to vector<1x8x1xf32>
    %53 = arith.maximumf %51, %52 : vector<1x8x1xf32>
    %cst_24 = arith.constant 9.99999974E-6 : f32
    %54 = vector.broadcast %cst_24 : f32 to vector<1x8x1xf32>
    %55 = arith.addf %53, %54 : vector<1x8x1xf32>
    %56 = math.rsqrt %55 : vector<1x8x1xf32>
    %57 = vector.broadcast %47 : vector<1x8x1xf32> to vector<4x8x256xf32>
    %58 = arith.subf %36, %57 : vector<4x8x256xf32>
    %59 = vector.broadcast %56 : vector<1x8x1xf32> to vector<4x8x256xf32>
    %60 = arith.mulf %58, %59 : vector<4x8x256xf32>
    %cst_25 = arith.constant 0.000000e+00 : f32
    %61 = vector.broadcast %cst_25 : f32 to vector<4x8x256xf32>
    %62 = arith.maximumf %60, %61 : vector<4x8x256xf32>
    %63 = arith.truncf %62 : vector<4x8x256xf32> to vector<4x8x256xbf16>
    %c0_26 = arith.constant 0 : index
    %c0_27 = arith.constant 0 : index
    %c0_28 = arith.constant 0 : index
    %c256 = arith.constant 256 : index
    %64 = vector.load %arg3[%c0_26, %c0_27, %c0_28, %c256] : memref<1x4x8x512xbf16, #tpu.memory_space<vmem>>, vector<1x4x8x256xbf16>
    %65 = vector.shape_cast %64 : vector<1x4x8x256xbf16> to vector<4x8x256xbf16>
    %66 = vector.shape_cast %63 : vector<4x8x256xbf16> to vector<1x4x8x256xbf16>
    tpu.vector_store %arg3[%c0_26, %c0_27, %c0_28, %c256], %66 {strides = array<i32>} : memref<1x4x8x512xbf16, #tpu.memory_space<vmem>>, vector<1x4x8x256xbf16>,
    return
  }
  func.func @transform_0(%arg0: i32) -> (i32, i32, i32) {
    %c0_i32 = arith.constant 0 : i32
    %c0_i32_0 = arith.constant 0 : i32
    %c0_i32_1 = arith.constant 0 : i32
    return %arg0, %c0_i32, %c0_i32_0 : i32, i32, i32
  }
  func.func @transform_1(%arg0: i32) -> (i32, i32) {
    %c0_i32 = arith.constant 0 : i32
    %c0_i32_0 = arith.constant 0 : i32
    %c0_i32_1 = arith.constant 0 : i32
    return %c0_i32, %c0_i32_0 : i32, i32
  }
  func.func @transform_2(%arg0: i32) -> (i32, i32, i32, i32) {
    %c0_i32 = arith.constant 0 : i32
    %c0_i32_0 = arith.constant 0 : i32
    %c0_i32_1 = arith.constant 0 : i32
    %c0_i32_2 = arith.constant 0 : i32
    return %arg0, %c0_i32, %c0_i32_0, %c0_i32_1 : i32, i32, i32, i32
  }
}

</mosaic_0001>

<bundles_post_ra>
// kernel: tpu_custom_call.1
= control target key start
LH: loop header
LB: loop body
LE: loop exit
PB: predicated region body
PF: predicated region fallthrough
CT: control target
= control target key end

     0   :  { %7 = vsyncpa [#allocation3], 0  ;;  %s584_s0 = inlined_call_operand.hbm [shape: bf16[1,16,512], index: 0, kind: input, shape index: {}]   ;;  %s585_s1 = inlined_call_operand.vmem [shape: bf16[32,16], index: 1, kind: input, shape index: {}]   ;;  %s586_s2 = inlined_call_operand.hbm [shape: bf16[1,4,8,512], index: 2, kind: output, shape index: {}]  }
   0x1   :  { %8 = vsyncpa [#allocation4], 0  ;;  %s13_s11 = sshll.u32 %s584_s0, 4  ;;  %s439_s12 = smov [#allocation2]   ;;  %s14_s11 = int_to_ptr.hbm [resolvable:$true] %s13_s11 }
   0x2   :  { %s15_s13 = sshll.u32 %s439_s12, 4  ;;  %s440_s14 = smov 256   ;;  %s16_s13 = int_to_ptr.vmem [resolvable:$true] %s15_s13 }
   0x3   :  { %s441_s15 = smov 16  }
   0x4   :  { %21 = dma.hbm_to_vmem [thread:$0]  %s14_s11, 512, %s16_s13, [#allocation3], %s440_s14, %s440_s14, %s441_s15  }
   0x5   :  { %435 = dma.done.wait [#allocation3], 512  }
   0x6   :  { %436 = vsyncadd [#allocation3], 4294966784  ;;  %v351_v0 = vld [vmem:[#allocation2] sm:$0xf]  ;;  %v377_v1 = vld [vmem:[#allocation2 + $0xc] sm:$0xf0] }
   0x7   :  { %v375_v2 = vld [vmem:[#allocation2 + $0x4] sm:$0xf]  ;;  %v352_v3 = vor.u32 %v377_v1, %v351_v0  ;;  %v353_v4 = vld [vmem:[#allocation2 + $0x10] sm:$0xf0]  ;;  %v359_v5 = vld [vmem:[#allocation2 + $0x8] sm:$0xf] }
   0x8   :  { %v378_v6 = vld [vmem:[#allocation2 + $0x14] sm:$0xf0]  ;;  %v356_v7 = vor.u32 %v375_v2, %v353_v4  ;;  %v376_v9 = vld [vmem:[#allocation2 + $0xc] sm:$0xf]  ;;  %v361_v10 = vld [vmem:[#allocation2 + $0x18] sm:$0xf0] }
   0x9   :  { %v360_v8 = vor.u32 %v378_v6, %v359_v5  ;;  %v373_v11 = vld [vmem:[%s585_s1] sm:$0xff]  ;;  %81 = vmatpush.bf16.msra.mxu0 %v352_v3  ;;  %v364_v12 = vor.u32 %v376_v9, %v361_v10  ;;  %vm67_vm0 = vcmask 130048   ;;  %v374_v13 = vld [vmem:[%s585_s1 + $0x8] sm:$0xff]  ;;  %s442_s1 = smov [#allocation5]   ;;  %s328_s22 = sshll.u32 %s586_s2, 4  ;;  %s329_s22 = int_to_ptr.hbm [resolvable:$true] %s328_s22 }
   0xa   :  { %100 = vmatpush.bf16.msra.mxu1 %v356_v7  ;;  %s326_s19 = sshll.u32 %s442_s1, 4  ;;  %s327_s19 = int_to_ptr.vmem [resolvable:$true] %s326_s19 }
   0xb   :  { %119 = vmatpush.bf16.msra.mxu2 %v360_v8  ;;  %138 = vmatpush.bf16.msra.mxu3 %v364_v12 }
   0xc   :  { %365 = vmatmul.msk.bf16.vlgmr.msra.gmra.mxu0 %vm67_vm0, %v373_v11 }
   0xd   :  { %367 = vmatmul.msk.bf16.vlgmr.msra.gmra.mxu1 %vm67_vm0, %v373_v11 }
   0xe   :  { %369 = vmatmul.msk.bf16.vlgmr.msra.gmra.mxu2 %vm67_vm0, %v373_v11  ;;  %371 = vmatmul.msk.bf16.vlgmr.msra.gmra.mxu3 %vm67_vm0, %v373_v11 }
  0x1c   :  { %366 = vmatmul.msk.bf16.gmra.mxu0 %vm67_vm0, %v374_v13 }
  0x1d   :  { %368 = vmatmul.msk.bf16.gmra.mxu1 %vm67_vm0, %v374_v13 }
  0x1e   :  { %370 = vmatmul.msk.bf16.gmra.mxu2 %vm67_vm0, %v374_v13  ;;  %372 = vmatmul.msk.bf16.gmra.mxu3 %vm67_vm0, %v374_v13 }
  0x89   :  { %v470_v14 = vpop.f32.mrf.mxu0 }
  0x8a   :  { %v472_v15 = vpop.f32.mrf.mxu1  ;;  %v165_v16 = vmul.f32 %v470_v14, %v470_v14 }
  0x8b   :  { %v150_v17 = vadd.f32 %v472_v15, %v470_v14  ;;  %v166_v18 = vmul.f32 %v472_v15, %v472_v15 }
  0x8d   :  { %151 = vadd.xlane.f32.xlu0 %v150_v17  ;;  %v173_v19 = vadd.f32 %v166_v18, %v165_v16 }
  0x8f   :  { %174 = vadd.xlane.f32.xlu2 %v173_v19 }
  0x91   :  { %v480_v20 = vpop.f32.mrf.mxu2  ;;  %v482_v21 = vpop.f32.mrf.mxu3 }
  0x92   :  { %v484_v22 = vpop.f32.mrf.mxu0  ;;  %v251_v23 = vmul.f32 %v480_v20, %v480_v20  ;;  %v488_v24 = vpop.f32.mrf.mxu1  ;;  %v236_v25 = vadd.f32 %v482_v21, %v480_v20  ;;  %v252_v26 = vmul.f32 %v482_v21, %v482_v21 }
  0x93   :  { %v153_v27 = vadd.f32 %v488_v24, %v484_v22  ;;  %v167_v29 = vmul.f32 %v484_v22, %v484_v22  ;;  %v168_v30 = vmul.f32 %v488_v24, %v488_v24 }
  0x94   :  { %237 = vadd.xlane.f32.xlu1 %v236_v25  ;;  %v259_v28 = vadd.f32 %v252_v26, %v251_v23 }
  0x95   :  { %154 = vadd.xlane.f32.xlu0 %v153_v27  ;;  %v176_v36 = vadd.f32 %v168_v30, %v167_v29 }
  0x97   :  { %260 = vadd.xlane.f32.xlu2 %v259_v28 }
  0x99   :  { %v500_v31 = vpop.f32.mrf.mxu2  ;;  %v502_v32 = vpop.f32.mrf.mxu3 }
  0x9a   :  { %v504_v33 = vpop.f32.mrf.mxu0  ;;  %v506_v34 = vpop.f32.mrf.mxu1  ;;  %v239_v35 = vadd.f32 %v502_v32, %v500_v31  ;;  %v253_v38 = vmul.f32 %v500_v31, %v500_v31  ;;  %v254_v39 = vmul.f32 %v502_v32, %v502_v32 }
  0x9b   :  { %v156_v37 = vadd.f32 %v506_v34, %v504_v33  ;;  %v169_v42 = vmul.f32 %v504_v33, %v504_v33  ;;  %v170_v43 = vmul.f32 %v506_v34, %v506_v34 }
  0x9c   :  { %240 = vadd.xlane.f32.xlu1 %v239_v35  ;;  %v262_v45 = vadd.f32 %v254_v39, %v253_v38 }
  0x9d   :  { %177 = vadd.xlane.f32.xlu0 %v176_v36  ;;  %v179_v46 = vadd.f32 %v170_v43, %v169_v42 }
  0x9f   :  { %157 = vadd.xlane.f32.xlu2 %v156_v37 }
  0xa1   :  { %v516_v40 = vpop.f32.mrf.mxu2  ;;  %v518_v41 = vpop.f32.mrf.mxu3 }
  0xa2   :  { %v242_v44 = vadd.f32 %v518_v41, %v516_v40  ;;  %v526_v47 = vpop.f32.mrf.mxu0  ;;  %v528_v48 = vpop.f32.mrf.mxu1  ;;  %v255_v56 = vmul.f32 %v516_v40, %v516_v40  ;;  %v256_v57 = vmul.f32 %v518_v41, %v518_v41 }
  0xa3   :  { %v171_v50 = vmul.f32 %v526_v47, %v526_v47  ;;  %v172_v51 = vmul.f32 %v528_v48, %v528_v48  ;;  %v159_v53 = vadd.f32 %v528_v48, %v526_v47 }
  0xa4   :  { %243 = vadd.xlane.f32.xlu1 %v242_v44  ;;  %v265_v60 = vadd.f32 %v256_v57, %v255_v56 }
  0xa5   :  { %263 = vadd.xlane.f32.xlu0 %v262_v45  ;;  %v182_v55 = vadd.f32 %v172_v51, %v171_v50 }
  0xa7   :  { %180 = vadd.xlane.f32.xlu2 %v179_v46 }
  0xa9   :  { %v530_v49 = vpop.f32.mrf.mxu2  ;;  %v536_v52 = vpop.f32.mrf.mxu3 }
  0xaa   :  { %v245_v54 = vadd.f32 %v536_v52, %v530_v49  ;;  %v257_v58 = vmul.f32 %v530_v49, %v530_v49  ;;  %v258_v59 = vmul.f32 %v536_v52, %v536_v52 }
  0xac   :  { %160 = vadd.xlane.f32.xlu1 %v159_v53  ;;  %v268_v61 = vadd.f32 %v258_v59, %v257_v58 }
  0xad   :  { %246 = vadd.xlane.f32.xlu0 %v245_v54 }
  0xaf   :  { %183 = vadd.xlane.f32.xlu2 %v182_v55 }
  0xb4   :  { %266 = vadd.xlane.f32.xlu1 %v265_v60 }
  0xb5   :  { %269 = vadd.xlane.f32.xlu0 %v268_v61 }
 0x100   :  { %v152_v62 = vpop.xlane.xlu0 %151 }
 0x102   :  { %v175_v63 = vpop.xlane.xlu2 %174 }
 0x107   :  { %v238_v0 = vpop.xlane.xlu1 %237 }
 0x108   :  { %v155_v1 = vpop.xlane.xlu0 %154 }
 0x109   :  { %v162_v9 = vadd.f32 %v155_v1, %v152_v62 }
 0x10a   :  { %v261_v2 = vpop.xlane.xlu2 %260 }
 0x10f   :  { %v241_v3 = vpop.xlane.xlu1 %240 }
 0x110   :  { %v178_v4 = vpop.xlane.xlu0 %177  ;;  %v248_v13 = vadd.f32 %v241_v3, %v238_v0 }
 0x111   :  { %v185_v11 = vadd.f32 %v178_v4, %v175_v63 }
 0x112   :  { %v158_v5 = vpop.xlane.xlu2 %157 }
 0x113   :  { %v163_v10 = vadd.f32 %v162_v9, %v158_v5 }
 0x117   :  { %v244_v6 = vpop.xlane.xlu1 %243 }
 0x118   :  { %v264_v7 = vpop.xlane.xlu0 %263  ;;  %v249_v19 = vadd.f32 %v248_v13, %v244_v6 }
 0x119   :  { %v271_v30 = vadd.f32 %v264_v7, %v261_v2 }
 0x11a   :  { %v181_v8 = vpop.xlane.xlu2 %180 }
 0x11b   :  { %v186_v18 = vadd.f32 %v185_v11, %v181_v8 }
 0x11f   :  { %v161_v12 = vpop.xlane.xlu1 %160 }
 0x120   :  { %v164_v16 = vadd.f32 %v163_v10, %v161_v12  ;;  %v247_v17 = vpop.xlane.xlu0 %246 }
 0x121   :  { %v250_v27 = vadd.f32 %v249_v19, %v247_v17 }
 0x122   :  { %v188_v23 = vmul.f32 0.0009765625, %v164_v16  ;;  %v184_v25 = vpop.xlane.xlu2 %183 }
 0x123   :  { %v187_v26 = vadd.f32 %v186_v18, %v184_v25  ;;  %v550_v37 = vmul.f32 0.0009765625, %v250_v27 }
 0x124   :  { %v190_v29 = vmul.f32 %v188_v23, %v188_v23  ;;  %v204_v62 = vsub.f32 %v470_v14, %v188_v23  ;;  %v205_v63 = vsub.f32 %v472_v15, %v188_v23  ;;  %v206_v0 = vsub.f32 %v484_v22, %v188_v23 }
 0x125   :  { %v189_v28 = vmul.f32 0.0009765625, %v187_v26  ;;  %v276_v45 = vmul.f32 %v550_v37, %v550_v37  ;;  %v207_v1 = vsub.f32 %v488_v24, %v188_v23  ;;  %v208_v2 = vsub.f32 %v504_v33, %v188_v23 }
 0x126   :  { %v209_v3 = vsub.f32 %v506_v34, %v188_v23  ;;  %v210_v5 = vsub.f32 %v526_v47, %v188_v23  ;;  %v211_v6 = vsub.f32 %v528_v48, %v188_v23 }
 0x127   :  { %v191_v35 = vsub.f32 %v189_v28, %v190_v29  ;;  %v267_v36 = vpop.xlane.xlu1 %266  ;;  %v290_v28 = vsub.f32 %v480_v20, %v550_v37  ;;  %v296_v20 = vsub.f32 %v530_v49, %v550_v37 }
 0x128   :  { %v272_v38 = vadd.f32 %v271_v30, %v267_v36  ;;  %v270_v39 = vpop.xlane.xlu0 %269  ;;  %v291_v30 = vsub.f32 %v482_v21, %v550_v37  ;;  %v293_v36 = vsub.f32 %v502_v32, %v550_v37 }
 0x129   :  { %v192_v42 = vmax.f32 %v191_v35, 0.0  ;;  %v292_v35 = vsub.f32 %v500_v31, %v550_v37 }
 0x12a   :  { %v273_v43 = vadd.f32 %v272_v38, %v270_v39  ;;  %v294_v38 = vsub.f32 %v516_v40, %v550_v37  ;;  %v295_v39 = vsub.f32 %v518_v41, %v550_v37 }
 0x12b   :  { %v193_v44 = vadd.f32 1e-05, %v192_v42  ;;  %v297_v42 = vsub.f32 %v536_v52, %v550_v37 }
 0x12c   :  { %v275_v46 = vmul.f32 0.0009765625, %v273_v43 }
 0x12d   :  { %383 = vrsqrt.f32 %v193_v44  ;;  %vm200_vm2 = vweird.f32 %v193_v44 }
 0x12e   :  { %v277_v50 = vsub.f32 %v275_v46, %v276_v45 }
 0x130   :  { %v278_v51 = vmax.f32 %v277_v50, 0.0 }
 0x132   :  { %v279_v53 = vadd.f32 1e-05, %v278_v51 }
 0x133   :  { %v384_v54 = vpop.eup %383 }
 0x134   :  { %v195_v55 = vmul.f32 %v384_v54, %v193_v44  ;;  %385 = vrsqrt.f32 %v279_v53  ;;  %vm201_vm1 = vweird.f32 %v384_v54  ;;  %vm286_vm5 = vweird.f32 %v279_v53 }
 0x135   :  { %vm202_vm3 = vmor %vm200_vm2, %vm201_vm1 }
 0x136   :  { %v196_v56 = vmul.f32 %v384_v54, %v195_v55 }
 0x138   :  { %v197_v57 = vmul.f32 0.5, %v196_v56 }
 0x13a   :  { %v386_v58 = vpop.eup %385  ;;  %v198_v59 = vsub.f32 1.5, %v197_v57 }
 0x13b   :  { %v281_v60 = vmul.f32 %v386_v58, %v279_v53  ;;  %vm287_vm4 = vweird.f32 %v386_v58 }
 0x13c   :  { %v199_v61 = vmul.f32 %v384_v54, %v198_v59  ;;  %vm288_vm6 = vmor %vm286_vm5, %vm287_vm4 }
 0x13d   :  { %v282_v7 = vmul.f32 %v386_v58, %v281_v60 }
 0x13e   :  { %v203_v4 = vsel %vm202_vm3, %v384_v54, %v199_v61 }
 0x13f   :  { %v212_v8 = vmul.f32 %v204_v62, %v203_v4  ;;  %v213_v9 = vmul.f32 %v205_v63, %v203_v4  ;;  %v214_v14 = vmul.f32 %v206_v0, %v203_v4  ;;  %v215_v10 = vmul.f32 %v207_v1, %v203_v4 }
 0x140   :  { %v216_v15 = vmul.f32 %v208_v2, %v203_v4  ;;  %v217_v11 = vmul.f32 %v209_v3, %v203_v4  ;;  %v218_v12 = vmul.f32 %v210_v5, %v203_v4  ;;  %v219_v22 = vmul.f32 %v211_v6, %v203_v4 }
 0x141   :  { %v220_v13 = vmax.f32 %v212_v8, 0.0  ;;  %v221_v24 = vmax.f32 %v213_v9, 0.0  ;;  %v222_v16 = vmax.f32 %v214_v14, 0.0  ;;  %v223_v33 = vmax.f32 %v215_v10, 0.0 }
 0x142   :  { %v224_v17 = vmax.f32 %v216_v15, 0.0  ;;  %v225_v34 = vmax.f32 %v217_v11, 0.0  ;;  %v226_v18 = vmax.f32 %v218_v12, 0.0  ;;  %v227_v19 = vmax.f32 %v219_v22, 0.0 }
 0x143   :  { %v228_v47 = vpack.c.bf16 %v221_v24, %v220_v13  ;;  %v229_v25 = vpack.c.bf16 %v223_v33, %v222_v16  ;;  %v283_v48 = vmul.f32 0.5, %v282_v7 }
 0x144   :  { %v230_v23 = vpack.c.bf16 %v225_v34, %v224_v17  ;;  %v231_v26 = vpack.c.bf16 %v227_v19, %v226_v18 }
 0x145   :  { %232 = vst [vmem:[#allocation5] sm:$0xff] %v228_v47  ;;  %v284_v27 = vsub.f32 1.5, %v283_v48 }
 0x146   :  { %233 = vst [vmem:[#allocation5 + $0x10] sm:$0xff] %v229_v25 }
 0x147   :  { %234 = vst [vmem:[#allocation5 + $0x20] sm:$0xff] %v230_v23  ;;  %v285_v29 = vmul.f32 %v386_v58, %v284_v27 }
 0x148   :  { %235 = vst [vmem:[#allocation5 + $0x30] sm:$0xff] %v231_v26 }
 0x149   :  { %v289_v21 = vsel %vm288_vm6, %v386_v58, %v285_v29 }
 0x14a   :  { %v298_v43 = vmul.f32 %v290_v28, %v289_v21  ;;  %v299_v44 = vmul.f32 %v291_v30, %v289_v21  ;;  %v300_v31 = vmul.f32 %v292_v35, %v289_v21  ;;  %v301_v45 = vmul.f32 %v293_v36, %v289_v21 }
 0x14b   :  { %v302_v46 = vmul.f32 %v294_v38, %v289_v21  ;;  %v303_v32 = vmul.f32 %v295_v39, %v289_v21  ;;  %v304_v50 = vmul.f32 %v296_v20, %v289_v21  ;;  %v305_v51 = vmul.f32 %v297_v42, %v289_v21 }
 0x14c   :  { %v306_v40 = vmax.f32 %v298_v43, 0.0  ;;  %v307_v53 = vmax.f32 %v299_v44, 0.0  ;;  %v308_v54 = vmax.f32 %v300_v31, 0.0  ;;  %v309_v55 = vmax.f32 %v301_v45, 0.0 }
 0x14d   :  { %v310_v41 = vmax.f32 %v302_v46, 0.0  ;;  %v311_v56 = vmax.f32 %v303_v32, 0.0  ;;  %v312_v57 = vmax.f32 %v304_v50, 0.0  ;;  %v313_v49 = vmax.f32 %v305_v51, 0.0 }
 0x14e   :  { %v314_v59 = vpack.c.bf16 %v307_v53, %v306_v40  ;;  %v315_v60 = vpack.c.bf16 %v309_v55, %v308_v54 }
 0x14f   :  { %v316_v52 = vpack.c.bf16 %v311_v56, %v310_v41  ;;  %v317_v37 = vpack.c.bf16 %v313_v49, %v312_v57 }
 0x150   :  { %318 = vst [vmem:[#allocation5 + $0x8] sm:$0xff] %v314_v59 }
 0x151   :  { %319 = vst [vmem:[#allocation5 + $0x18] sm:$0xff] %v315_v60 }
 0x152   :  { %320 = vst [vmem:[#allocation5 + $0x28] sm:$0xff] %v316_v52 }
 0x153   :  { %321 = vst [vmem:[#allocation5 + $0x38] sm:$0xff] %v317_v37 }
 0x154   :  { %334 = dma.vmem_to_hbm [thread:$0]  %s327_s19, 1024, %s329_s22, [#allocation4], %s440_s14, %s440_s14, %s441_s15  }
 0x155   :  { %437 = dma.done.wait [#allocation4], 1024  }
 0x156   :  { %438 = vsyncadd [#allocation4], 4294966272 }
 0x157   :  { %339 = vsyncpa [#allocation3], 1 }
 0x158   :  { %340 = vsyncpa [#allocation4], 1 }

</bundles_post_ra>
